<compile_context>
chip_gen: v5e
topology: v5e:2x2
jax: 0.10.0
libtpu: 0.0.40
codegen_flags: <defaults>
</compile_context>

<pallas_src>
import functools

import jax
import jax.numpy as jnp
from jax.experimental import pallas as pl
from jax.experimental.pallas import tpu as pltpu

_F32 = 4  # bytes per element


# --------------------------------------------------------------------------
# Kernels
# --------------------------------------------------------------------------
def _proj_norm_kernel(e_ref, w_ref, an_ref):
    # A = E @ W on the MXU, then F.normalize(p=2, dim=1, eps=1e-12):
    # a * rsqrt(max(sum(a^2), 1e-24)) -- rsqrt on the EUP, no sqrt+div.
    a = jnp.dot(e_ref[...], w_ref[...], preferred_element_type=jnp.float32)
    inv_norm = jax.lax.rsqrt(
        jnp.maximum(jnp.sum(a * a, axis=-1, keepdims=True), 1e-24))
    an_ref[...] = a * inv_norm


def _similarity_kernel(an_tile_ref, an_full_ref, ahat_ref, dinv_ref, *, delta):
    an_i = an_tile_ref[...]                                        # (tm, Dout)
    an_all = an_full_ref[...]                                      # (Np, Dout)
    # Contract the last axis of both operands directly -> no An.T transpose.
    s = jax.lax.dot_general(an_i, an_all,
                            dimension_numbers=(((1,), (1,)), ((), ())),
                            preferred_element_type=jnp.float32)    # (tm, Np)
    a_hat = jnp.where(s > delta, s, 0.0)                           # one vselect
    ahat_ref[...] = a_hat
    # D = 1/sqrt(rowsum + 1e-8) on the EUP.
    dinv_ref[...] = jax.lax.rsqrt(jnp.sum(a_hat, axis=1, keepdims=True) + 1e-8)


def _fused_propagate_kernel(a_ref, dinv_ref, e_ref, out_ref, c_ref,
                            *, tm, n_pad, resident_a):
    """Fused multi-layer propagation.  grid = (L, n_tiles), both 'arbitrary'.

    out_ref : full (Np, Din) constant-index output block == accumulator
              E + sum_l layer_l (single HBM writeback at the end).
    c_ref   : (2*Np, Din) scratch; slot (l+1)%2 holds dinv * layer_{l-1},
              slot l%2 receives dinv * layer_l.
    A_tilda is never materialized: A_til @ x == dinv * (A_hat @ (dinv * x)).
    """
    l = pl.program_id(0)
    i = pl.program_id(1)
    row0 = pl.multiple_of(i * tm, 8)

    @pl.when(jnp.logical_and(l == 0, i == 0))
    def _init():
        e = e_ref[...]
        out_ref[...] = e                                    # acc = E
        c_ref[pl.ds(n_pad, n_pad), :] = dinv_ref[...] * e   # "layer -1" = E

    slot_r = pl.multiple_of(jax.lax.rem(l + 1, 2) * n_pad, 8)
    slot_w = pl.multiple_of(jax.lax.rem(l, 2) * n_pad, 8)

    if resident_a:
        a_rows = a_ref[pl.ds(row0, tm), :]      # A_hat fully VMEM-resident
    else:
        a_rows = a_ref[...]                     # streamed (tm, Np) row tile
    dinv_rows = dinv_ref[pl.ds(row0, tm), :]    # (tm, 1)

    y = jnp.dot(a_rows, c_ref[pl.ds(slot_r, n_pad), :],
                preferred_element_type=jnp.float32)          # MXU (tm, Din)
    new_rows = jnp.maximum(dinv_rows * y, 0.0)               # relu(A_til @ x)
    c_ref[pl.ds(pl.multiple_of(slot_w + row0, 8), tm), :] = dinv_rows * new_rows
    out_ref[pl.ds(row0, tm), :] = out_ref[pl.ds(row0, tm), :] + new_rows


# --------------------------------------------------------------------------
# Wrapper helpers
# --------------------------------------------------------------------------
def _round_up(x, m):
    return ((x + m - 1) // m) * m


@functools.lru_cache(maxsize=1)
def _vmem_budget_bytes():
    # ~80% of physical VMEM: leaves headroom for Mosaic internal scratch and
    # semaphores.  v7x: ~51 of 64 MiB; v5e/v6e: ~102 of 128 MiB.
    try:
        cap = int(pltpu.get_tpu_info().vmem_capacity_bytes)
    except Exception:  # query unsupported (e.g. interpret mode): be conservative
        cap = 64 * 1024 * 1024
    return (cap * 4) // 5


def _vmem_limit(bytes_needed):
    # Callers pass real accounting (2x only for pipelined tiles, 1x for
    # constant-index resident operands); add fixed slack, clamp to the budget.
    return int(min(max(bytes_needed + (2 << 20), 4 << 20), _vmem_budget_bytes()))


def _pick_tiling(n, row_tile=None, cap=256):
    """Return (tm, n_pad): row tile (multiple of 8) and padded node count."""
    if row_tile is not None:
        tm = max(8, _round_up(int(row_tile), 8))
        return tm, _round_up(n, tm)
    if n <= cap:
        n_pad = _round_up(n, 8)
        return n_pad, n_pad
    return cap, _round_up(n, cap)


# --------------------------------------------------------------------------
# Forward
# --------------------------------------------------------------------------
def agcn_forward(e_weight, weight, *, delta=0.0, num_layers=2, row_tile=None):
    """e_weight: (N+1, Din) embedding table; weight: (Din, Dout).

    Returns (result, A_hat) matching PyTorch AGCN.forward (dropout omitted).
    """
    e_weight = jnp.asarray(e_weight, jnp.float32)
    weight = jnp.asarray(weight, jnp.float32)
    n_plus_1, din = e_weight.shape
    dout = weight.shape[1]
    n = n_plus_1 - 1
    n_layers = max(1, int(num_layers))   # the torch loop always propagates >= 1

    tm, n_pad = _pick_tiling(n, row_tile)
    n_tiles = n_pad // tm
    budget = _vmem_budget_bytes()

    # Node embeddings (special row 0 kept aside), zero-padded to the row tile.
    # Zero rows are inert through the whole pipeline (An row = 0 -> S row/col
    # = 0 -> A_hat = 0 -> layer rows = 0) and keep every block (8,128)-aligned.
    e_nodes = jnp.pad(e_weight[1:, :], ((0, n_pad - n), (0, 0)))

    # ---- K1: An = normalize(E @ W), row-tiled, megacore-parallel -----------
    k1_bytes = _F32 * (2 * tm * din + din * dout + 2 * tm * dout)
    an = pl.pallas_call(
        _proj_norm_kernel,
        grid=(n_tiles,),
        out_shape=jax.ShapeDtypeStruct((n_pad, dout), jnp.float32),
        in_specs=[pl.BlockSpec((tm, din), lambda i: (i, 0)),
                  pl.BlockSpec((din, dout), lambda i: (0, 0))],
        out_specs=pl.BlockSpec((tm, dout), lambda i: (i, 0)),
        compiler_params=pltpu.CompilerParams(
            dimension_semantics=("parallel",),
            vmem_limit_bytes=_vmem_limit(k1_bytes)),
        cost_estimate=pl.CostEstimate(
            flops=2 * n_pad * din * dout + 3 * n_pad * dout,
            transcendentals=n_pad,
            bytes_accessed=_F32 * (n_pad * din + din * dout + n_pad * dout)),
    )(e_nodes, weight)

    # ---- K2: thresholded cosine similarity + inverse-sqrt degree -----------
    k2_bytes = _F32 * (2 * tm * dout + n_pad * dout
                       + 2 * tm * n_pad + 2 * tm * 128)
    a_hat, dinv = pl.pallas_call(
        functools.partial(_similarity_kernel, delta=float(delta)),
        grid=(n_tiles,),
        out_shape=(jax.ShapeDtypeStruct((n_pad, n_pad), jnp.float32),
                   jax.ShapeDtypeStruct((n_pad, 1), jnp.float32)),
        in_specs=[pl.BlockSpec((tm, dout), lambda i: (i, 0)),
                  pl.BlockSpec((n_pad, dout), lambda i: (0, 0))],
        out_specs=(pl.BlockSpec((tm, n_pad), lambda i: (i, 0)),
                   pl.BlockSpec((tm, 1), lambda i: (i, 0))),
        compiler_params=pltpu.CompilerParams(
            dimension_semantics=("parallel",),
            vmem_limit_bytes=_vmem_limit(k2_bytes)),
        cost_estimate=pl.CostEstimate(
            flops=2 * n_pad * n_pad * dout + 4 * n_pad * n_pad,
            transcendentals=n_pad,
            bytes_accessed=_F32 * (2 * n_pad * dout + n_pad * n_pad + n_pad)),
    )(an, an)

    # ---- K3: fused multi-layer residual propagation (single pallas_call) ---
    k3_common = _F32 * (n_pad * 128 + 4 * n_pad * din)  # dinv + E + out + c(x2)
    resident_a = (k3_common + _F32 * n_pad * n_pad + (2 << 20)) <= budget
    if resident_a:
        a_spec = pl.BlockSpec((n_pad, n_pad), lambda l, i: (0, 0))  # DMA once
        k3_bytes = k3_common + _F32 * n_pad * n_pad
        a_hbm_bytes = _F32 * n_pad * n_pad
    else:
        a_spec = pl.BlockSpec((tm, n_pad), lambda l, i: (i, 0))     # stream
        k3_bytes = k3_common + _F32 * 2 * tm * n_pad
        a_hbm_bytes = _F32 * n_pad * n_pad * n_layers

    result_nodes = pl.pallas_call(
        functools.partial(_fused_propagate_kernel, tm=tm, n_pad=n_pad,
                          resident_a=resident_a),
        grid=(n_layers, n_tiles),
        out_shape=jax.ShapeDtypeStruct((n_pad, din), jnp.float32),
        in_specs=[a_spec,
                  pl.BlockSpec((n_pad, 1), lambda l, i: (0, 0)),
                  pl.BlockSpec((n_pad, din), lambda l, i: (0, 0))],
        out_specs=pl.BlockSpec((n_pad, din), lambda l, i: (0, 0)),
        scratch_shapes=[pltpu.VMEM((2 * n_pad, din), jnp.float32)],
        compiler_params=pltpu.CompilerParams(
            dimension_semantics=("arbitrary", "arbitrary"),
            vmem_limit_bytes=_vmem_limit(k3_bytes)),
        cost_estimate=pl.CostEstimate(
            flops=n_layers * (2 * n_pad * n_pad * din + 4 * n_pad * din),
            transcendentals=0,
            bytes_accessed=a_hbm_bytes + _F32 * (2 * n_pad * din + n_pad)),
    )(a_hat, dinv, e_nodes)

    # Row 0 of the table passes through untouched; padded rows are dropped.
    result = jnp.concatenate([e_weight[0:1, :], result_nodes[:n, :]], axis=0)
    return result, a_hat[:n, :n]


# --------------------------------------------------------------------------
# Pure-JAX reference mirroring the PyTorch forward (dropout off)
# --------------------------------------------------------------------------
def _reference(e_weight, weight, *, delta=0.0, num_layers=2):
    E = e_weight[1:, :]
    A = E @ weight
    norm = jnp.maximum(jnp.sqrt(jnp.sum(A * A, axis=-1, keepdims=True)), 1e-12)
    An = A / norm
    S = An @ An.T
    A_hat = S * (S > delta)
    d = 1.0 / jnp.sqrt(jnp.sum(A_hat, axis=1, keepdims=True) + 1e-8)
    D_hat = jnp.eye(A_hat.shape[0]) * d
    A_tilda = D_hat @ A_hat @ D_hat
    result = [E]
    layer = jax.nn.relu(A_tilda @ E)
    result.append(layer)
    for _ in range(1, num_layers):
        layer = jax.nn.relu(A_tilda @ layer)
        result.append(layer)
    res = jnp.sum(jnp.stack(result, axis=1), axis=1)
    res = jnp.concatenate([e_weight[0:1, :], res], axis=0)
    return res, A_hat


if __name__ == "__main__":
    key = jax.random.PRNGKey(0)

    configs = [
        # (num_embeddings, input_dim, output_dim, num_layers, delta, row_tile)
        (9, 128, 128, 2, 0.0, None),    # N=8 toy: single padded tile
        (65, 128, 256, 3, 0.0, 16),     # N=64: 4 row tiles, fused 3-layer prop
        (30, 128, 128, 2, 0.0, None),   # N=29: exercises zero-row padding
    ]

    for num_emb, din, dout, num_layers, delta, row_tile in configs:
        key, k_e, k_w = jax.random.split(key, 3)
        # nn.Embedding default init: N(0, 1)
        e_weight = jax.random.normal(k_e, (num_emb, din), jnp.float32)
        # AGCN weight init: U(-1/sqrt(input_dim), 1/sqrt(input_dim))
        bound = 1.0 / (din ** 0.5)
        weight = jax.random.uniform(k_w, (din, dout), jnp.float32,
                                    minval=-bound, maxval=bound)

        fwd = jax.jit(functools.partial(agcn_forward, delta=delta,
                                        num_layers=num_layers,
                                        row_tile=row_tile))
        result, a_hat = fwd(e_weight, weight)
        result = jax.block_until_ready(result)
        a_hat = jax.block_until_ready(a_hat)

        ref_result, ref_a_hat = _reference(e_weight, weight,
                                           delta=delta, num_layers=num_layers)
        assert result.shape == (num_emb, din)
        assert a_hat.shape == (num_emb - 1, num_emb - 1)
        assert jnp.allclose(result, ref_result, rtol=1e-4, atol=1e-4), (
            float(jnp.max(jnp.abs(result - ref_result))))
        assert jnp.allclose(a_hat, ref_a_hat, rtol=1e-4, atol=1e-4), (
            float(jnp.max(jnp.abs(a_hat - ref_a_hat))))

    print("KERNEL_OK")
</pallas_src>

<mosaic_0001>
module attributes {stable_mosaic.version = 11 : i64} {
  func.func @_similarity_kernel(%arg0: i32, %arg1: memref<8x128xf32, #tpu.memory_space<vmem>>, %arg2: memref<8x128xf32, #tpu.memory_space<vmem>>, %arg3: memref<8x8xf32, #tpu.memory_space<vmem>>, %arg4: memref<8x1xf32, #tpu.memory_space<vmem>>) attributes {dimension_semantics = [#tpu.dimension_semantics<parallel>], iteration_bounds = array<i64: 1>, scalar_prefetch = 0 : i64, scratch_operands = 0 : i64, tpu.core_type = #tpu.core_type<tc>, window_params = [{transform_indices = @transform_0, window_bounds = array<i64: 8, 128>}, {pipeline_mode = #tpu.pipeline_mode<synchronous>, transform_indices = @transform_1, window_bounds = array<i64: 8, 128>}, {transform_indices = @transform_2, window_bounds = array<i64: 8, 8>}, {transform_indices = @transform_3, window_bounds = array<i64: 8, 1>}]} {
    %c0 = arith.constant 0 : index
    %c0_0 = arith.constant 0 : index
    %0 = vector.load %arg1[%c0, %c0_0] : memref<8x128xf32, #tpu.memory_space<vmem>>, vector<8x128xf32>
    %c0_1 = arith.constant 0 : index
    %c0_2 = arith.constant 0 : index
    %1 = vector.load %arg2[%c0_1, %c0_2] : memref<8x128xf32, #tpu.memory_space<vmem>>, vector<8x128xf32>
    %cst = arith.constant dense<0.000000e+00> : vector<8x8xf32>
    %2 = tpu.matmul %0, %1, %cst {dimension_numbers = #tpu.dot_dimension_numbers<[1], [1], [0], [0], [0, 0, 1, 0], [], []>} : vector<8x128xf32>, vector<8x128xf32>, vector<8x8xf32> -> vector<8x8xf32>
    %cst_3 = arith.constant 0.000000e+00 : f32
    %3 = vector.broadcast %cst_3 : f32 to vector<8x8xf32>
    %4 = arith.cmpf ogt, %2, %3 : vector<8x8xf32>
    %cst_4 = arith.constant 0.000000e+00 : f32
    %5 = vector.broadcast %cst_4 : f32 to vector<8x8xf32>
    %6 = arith.select %4, %2, %5 : vector<8x8xi1>, vector<8x8xf32>
    %c0_5 = arith.constant 0 : index
    %c0_6 = arith.constant 0 : index
    %7 = vector.load %arg3[%c0_5, %c0_6] : memref<8x8xf32, #tpu.memory_space<vmem>>, vector<8x8xf32>
    tpu.vector_store %arg3[%c0_5, %c0_6], %6 {strides = array<i32>} : memref<8x8xf32, #tpu.memory_space<vmem>>, vector<8x8xf32>,
    %cst_7 = arith.constant dense<0.000000e+00> : vector<8xf32>
    %8 = vector.multi_reduction <add>, %6, %cst_7 [1] : vector<8x8xf32> to vector<8xf32>
    %9 = vector.shape_cast %8 : vector<8xf32> to vector<8x1xf32>
    %cst_8 = arith.constant 9.99999993E-9 : f32
    %10 = vector.broadcast %cst_8 : f32 to vector<8x1xf32>
    %11 = arith.addf %9, %10 : vector<8x1xf32>
    %12 = math.rsqrt %11 : vector<8x1xf32>
    %c0_9 = arith.constant 0 : index
    %c0_10 = arith.constant 0 : index
    %13 = vector.load %arg4[%c0_9, %c0_10] : memref<8x1xf32, #tpu.memory_space<vmem>>, vector<8x1xf32>
    tpu.vector_store %arg4[%c0_9, %c0_10], %12 {strides = array<i32>} : memref<8x1xf32, #tpu.memory_space<vmem>>, vector<8x1xf32>,
    return
  }
  func.func @transform_0(%arg0: i32) -> (i32, i32) {
    %c0_i32 = arith.constant 0 : i32
    %c0_i32_0 = arith.constant 0 : i32
    return %arg0, %c0_i32 : i32, i32
  }
  func.func @transform_1(%arg0: i32) -> (i32, i32) {
    %c0_i32 = arith.constant 0 : i32
    %c0_i32_0 = arith.constant 0 : i32
    %c0_i32_1 = arith.constant 0 : i32
    return %c0_i32, %c0_i32_0 : i32, i32
  }
  func.func @transform_2(%arg0: i32) -> (i32, i32) {
    %c0_i32 = arith.constant 0 : i32
    %c0_i32_0 = arith.constant 0 : i32
    return %arg0, %c0_i32 : i32, i32
  }
  func.func @transform_3(%arg0: i32) -> (i32, i32) {
    %c0_i32 = arith.constant 0 : i32
    %c0_i32_0 = arith.constant 0 : i32
    return %arg0, %c0_i32 : i32, i32
  }
}

module attributes {stable_mosaic.version = 11 : i64} {
  func.func @_proj_norm_kernel(%arg0: i32, %arg1: memref<8x128xf32, #tpu.memory_space<vmem>>, %arg2: memref<128x128xf32, #tpu.memory_space<vmem>>, %arg3: memref<8x128xf32, #tpu.memory_space<vmem>>) attributes {dimension_semantics = [#tpu.dimension_semantics<parallel>], iteration_bounds = array<i64: 1>, scalar_prefetch = 0 : i64, scratch_operands = 0 : i64, tpu.core_type = #tpu.core_type<tc>, window_params = [{transform_indices = @transform_0, window_bounds = array<i64: 8, 128>}, {pipeline_mode = #tpu.pipeline_mode<synchronous>, transform_indices = @transform_1, window_bounds = array<i64: 128, 128>}, {transform_indices = @transform_2, window_bounds = array<i64: 8, 128>}]} {
    %c0 = arith.constant 0 : index
    %c0_0 = arith.constant 0 : index
    %0 = vector.load %arg1[%c0, %c0_0] : memref<8x128xf32, #tpu.memory_space<vmem>>, vector<8x128xf32>
    %c0_1 = arith.constant 0 : index
    %c0_2 = arith.constant 0 : index
    %1 = vector.load %arg2[%c0_1, %c0_2] : memref<128x128xf32, #tpu.memory_space<vmem>>, vector<128x128xf32>
    %cst = arith.constant dense<0.000000e+00> : vector<8x128xf32>
    %2 = tpu.matmul %0, %1, %cst {dimension_numbers = #tpu.dot_dimension_numbers<[1], [0], [0], [1], [0, 0, 1, 1], [], []>} : vector<8x128xf32>, vector<128x128xf32>, vector<8x128xf32> -> vector<8x128xf32>
    %3 = arith.mulf %2, %2 : vector<8x128xf32>
    %cst_3 = arith.constant dense<0.000000e+00> : vector<8xf32>
    %4 = vector.multi_reduction <add>, %3, %cst_3 [1] : vector<8x128xf32> to vector<8xf32>
    %5 = vector.shape_cast %4 : vector<8xf32> to vector<8x1xf32>
    %cst_4 = arith.constant 1.000000e-24 : f32
    %6 = vector.broadcast %cst_4 : f32 to vector<8x1xf32>
    %7 = arith.maximumf %5, %6 : vector<8x1xf32>
    %8 = math.rsqrt %7 : vector<8x1xf32>
    %9 = vector.broadcast %8 : vector<8x1xf32> to vector<8x128xf32>
    %10 = arith.mulf %2, %9 : vector<8x128xf32>
    %c0_5 = arith.constant 0 : index
    %c0_6 = arith.constant 0 : index
    %11 = vector.load %arg3[%c0_5, %c0_6] : memref<8x128xf32, #tpu.memory_space<vmem>>, vector<8x128xf32>
    tpu.vector_store %arg3[%c0_5, %c0_6], %10 {strides = array<i32>} : memref<8x128xf32, #tpu.memory_space<vmem>>, vector<8x128xf32>,
    return
  }
  func.func @transform_0(%arg0: i32) -> (i32, i32) {
    %c0_i32 = arith.constant 0 : i32
    %c0_i32_0 = arith.constant 0 : i32
    return %arg0, %c0_i32 : i32, i32
  }
  func.func @transform_1(%arg0: i32) -> (i32, i32) {
    %c0_i32 = arith.constant 0 : i32
    %c0_i32_0 = arith.constant 0 : i32
    %c0_i32_1 = arith.constant 0 : i32
    return %c0_i32, %c0_i32_0 : i32, i32
  }
  func.func @transform_2(%arg0: i32) -> (i32, i32) {
    %c0_i32 = arith.constant 0 : i32
    %c0_i32_0 = arith.constant 0 : i32
    return %arg0, %c0_i32 : i32, i32
  }
}

module attributes {stable_mosaic.version = 11 : i64} {
  func.func @_fused_propagate_kernel(%arg0: i32, %arg1: i32, %arg2: memref<8x8xf32, #tpu.memory_space<vmem>>, %arg3: memref<8x1xf32, #tpu.memory_space<vmem>>, %arg4: memref<8x128xf32, #tpu.memory_space<vmem>>, %arg5: memref<8x128xf32, #tpu.memory_space<vmem>>, %arg6: memref<16x128xf32, #tpu.memory_space<vmem>>) attributes {dimension_semantics = [#tpu.dimension_semantics<arbitrary>, #tpu.dimension_semantics<arbitrary>], iteration_bounds = array<i64: 2, 1>, scalar_prefetch = 0 : i64, scratch_operands = 1 : i64, tpu.core_type = #tpu.core_type<tc>, window_params = [{pipeline_mode = #tpu.pipeline_mode<synchronous>, transform_indices = @transform_0, window_bounds = array<i64: 8, 8>}, {pipeline_mode = #tpu.pipeline_mode<synchronous>, transform_indices = @transform_1, window_bounds = array<i64: 8, 1>}, {pipeline_mode = #tpu.pipeline_mode<synchronous>, transform_indices = @transform_2, window_bounds = array<i64: 8, 128>}, {pipeline_mode = #tpu.pipeline_mode<synchronous>, transform_indices = @transform_3, window_bounds = array<i64: 8, 128>}]} {
    %c8_i32 = arith.constant 8 : i32
    %0 = arith.muli %arg1, %c8_i32 : i32
    %1 = tpu.assume_multiple %0, 8 : i32
    %c0_i32 = arith.constant 0 : i32
    %2 = arith.cmpi eq, %arg0, %c0_i32 : i32
    %c0_i32_0 = arith.constant 0 : i32
    %3 = arith.cmpi eq, %arg1, %c0_i32_0 : i32
    %4 = arith.andi %2, %3 : i1
    %5 = arith.extui %4 : i1 to i32
    %c0_i32_1 = arith.constant 0 : i32
    %6 = arith.cmpi ne, %5, %c0_i32_1 : i32
    scf.if %6 {
      %c0_11 = arith.constant 0 : index
      %c0_12 = arith.constant 0 : index
      %36 = vector.load %arg4[%c0_11, %c0_12] : memref<8x128xf32, #tpu.memory_space<vmem>>, vector<8x128xf32>
      %c0_13 = arith.constant 0 : index
      %c0_14 = arith.constant 0 : index
      %37 = vector.load %arg5[%c0_13, %c0_14] : memref<8x128xf32, #tpu.memory_space<vmem>>, vector<8x128xf32>
      tpu.vector_store %arg5[%c0_13, %c0_14], %36 {strides = array<i32>} : memref<8x128xf32, #tpu.memory_space<vmem>>, vector<8x128xf32>,
      %c0_15 = arith.constant 0 : index
      %c0_16 = arith.constant 0 : index
      %38 = vector.load %arg3[%c0_15, %c0_16] : memref<8x1xf32, #tpu.memory_space<vmem>>, vector<8x1xf32>
      %39 = vector.broadcast %38 : vector<8x1xf32> to vector<8x128xf32>
      %40 = arith.mulf %39, %36 : vector<8x128xf32>
      %c8 = arith.constant 8 : index
      %c0_17 = arith.constant 0 : index
      %41 = vector.load %arg6[%c8, %c0_17] : memref<16x128xf32, #tpu.memory_space<vmem>>, vector<8x128xf32>
      tpu.vector_store %arg6[%c8, %c0_17], %40 {strides = array<i32>} : memref<16x128xf32, #tpu.memory_space<vmem>>, vector<8x128xf32>,
    } else {
    }
    %c1_i32 = arith.constant 1 : i32
    %7 = arith.addi %arg0, %c1_i32 : i32
    %c2_i32 = arith.constant 2 : i32
    %8 = arith.remsi %7, %c2_i32 : i32
    %c8_i32_2 = arith.constant 8 : i32
    %9 = arith.muli %8, %c8_i32_2 : i32
    %10 = tpu.assume_multiple %9, 8 : i32
    %c2_i32_3 = arith.constant 2 : i32
    %11 = arith.remsi %arg0, %c2_i32_3 : i32
    %c8_i32_4 = arith.constant 8 : i32
    %12 = arith.muli %11, %c8_i32_4 : i32
    %13 = tpu.assume_multiple %12, 8 : i32
    %14 = arith.index_cast %1 : i32 to index
    %c0 = arith.constant 0 : index
    %15 = vector.load %arg2[%14, %c0] : memref<8x8xf32, #tpu.memory_space<vmem>>, vector<8x8xf32>
    %16 = arith.index_cast %1 : i32 to index
    %c0_5 = arith.constant 0 : index
    %17 = vector.load %arg3[%16, %c0_5] : memref<8x1xf32, #tpu.memory_space<vmem>>, vector<8x1xf32>
    %18 = arith.index_cast %10 : i32 to index
    %c0_6 = arith.constant 0 : index
    %19 = vector.load %arg6[%18, %c0_6] : memref<16x128xf32, #tpu.memory_space<vmem>>, vector<8x128xf32>
    %cst = arith.constant dense<0.000000e+00> : vector<8x128xf32>
    %20 = tpu.matmul %15, %19, %cst {dimension_numbers = #tpu.dot_dimension_numbers<[1], [0], [0], [1], [0, 0, 1, 1], [], []>} : vector<8x8xf32>, vector<8x128xf32>, vector<8x128xf32> -> vector<8x128xf32>
    %21 = vector.broadcast %17 : vector<8x1xf32> to vector<8x128xf32>
    %22 = arith.mulf %21, %20 : vector<8x128xf32>
    %cst_7 = arith.constant 0.000000e+00 : f32
    %23 = vector.broadcast %cst_7 : f32 to vector<8x128xf32>
    %24 = arith.maximumf %22, %23 : vector<8x128xf32>
    %25 = vector.broadcast %17 : vector<8x1xf32> to vector<8x128xf32>
    %26 = arith.mulf %25, %24 : vector<8x128xf32>
    %27 = arith.addi %13, %1 : i32
    %28 = tpu.assume_multiple %27, 8 : i32
    %29 = arith.index_cast %28 : i32 to index
    %c0_8 = arith.constant 0 : index
    %30 = vector.load %arg6[%29, %c0_8] : memref<16x128xf32, #tpu.memory_space<vmem>>, vector<8x128xf32>
    tpu.vector_store %arg6[%29, %c0_8], %26 {strides = array<i32>} : memref<16x128xf32, #tpu.memory_space<vmem>>, vector<8x128xf32>,
    %31 = arith.index_cast %1 : i32 to index
    %c0_9 = arith.constant 0 : index
    %32 = vector.load %arg5[%31, %c0_9] : memref<8x128xf32, #tpu.memory_space<vmem>>, vector<8x128xf32>
    %33 = arith.addf %32, %24 : vector<8x128xf32>
    %34 = arith.index_cast %1 : i32 to index
    %c0_10 = arith.constant 0 : index
    %35 = vector.load %arg5[%34, %c0_10] : memref<8x128xf32, #tpu.memory_space<vmem>>, vector<8x128xf32>
    tpu.vector_store %arg5[%34, %c0_10], %33 {strides = array<i32>} : memref<8x128xf32, #tpu.memory_space<vmem>>, vector<8x128xf32>,
    return
  }
  func.func @transform_0(%arg0: i32, %arg1: i32) -> (i32, i32) {
    %c0_i32 = arith.constant 0 : i32
    %c0_i32_0 = arith.constant 0 : i32
    %c0_i32_1 = arith.constant 0 : i32
    return %c0_i32, %c0_i32_0 : i32, i32
  }
  func.func @transform_1(%arg0: i32, %arg1: i32) -> (i32, i32) {
    %c0_i32 = arith.constant 0 : i32
    %c0_i32_0 = arith.constant 0 : i32
    %c0_i32_1 = arith.constant 0 : i32
    return %c0_i32, %c0_i32_0 : i32, i32
  }
  func.func @transform_2(%arg0: i32, %arg1: i32) -> (i32, i32) {
    %c0_i32 = arith.constant 0 : i32
    %c0_i32_0 = arith.constant 0 : i32
    %c0_i32_1 = arith.constant 0 : i32
    return %c0_i32, %c0_i32_0 : i32, i32
  }
  func.func @transform_3(%arg0: i32, %arg1: i32) -> (i32, i32) {
    %c0_i32 = arith.constant 0 : i32
    %c0_i32_0 = arith.constant 0 : i32
    %c0_i32_1 = arith.constant 0 : i32
    return %c0_i32, %c0_i32_0 : i32, i32
  }
}

</mosaic_0001>

<bundles_post_ra>
// kernel: agcn_forward.5
= control target key start
LH: loop header
LB: loop body
LE: loop exit
PB: predicated region body
PF: predicated region fallthrough
CT: control target
= control target key end

     0   :  { %s347_s12 = smov 0   ;;  %s349_s13 = smov 0   ;;  %s402_s0 = inlined_call_operand.vmem [shape: f32[8,8], index: 0, kind: input, shape index: {}]   ;;  %s403_s1 = inlined_call_operand.vmem [shape: f32[8,1], index: 1, kind: input, shape index: {}]   ;;  %s404_s2 = inlined_call_operand.vmem [shape: f32[8,128], index: 2, kind: input, shape index: {}]   ;;  %s405_s3 = inlined_call_operand.vmem [shape: f32[8,128], index: 3, kind: output, shape index: {}]  }
   0x1   :  { %s351_s14 = smov 0  }
   0x2 LB: > { %s25_s15 = sadd.s32 1, %s319_s13  ;;  %p263_p0 = scmp.ge.s32.totalorder %s323_s14, 1  ;;  %s323_s14 = sphi %s351_s14, %s13_s14   ;;  %s319_s13 = sphi %s349_s13, %s407_s13   ;;  %s315_s12 = sphi %s347_s12, %s406_s12  }
   0x3   : > { %p27_p1 = scmp.ge.s32.totalorder %s25_s15, 2  ;;  %p134_p2 = scmp.lt.s32.totalorder %s323_s14, 3 }
   0x5   : > { %s409_s15 = smov (%p27_p1, %s25_s15), 0  ;;  %p135_p3 = pnand %p263_p0, %p134_p2 }
   0x6   : > { %p149_p4 = scmp.eq.s32.totalorder (!%p135_p3), %s315_s12, 0 }
   0x7   : > { %138 = sbr.rel (%p135_p3) target bundleno = 276 (0x114), region = 32 }
   0xc   : > { %154 = sbr.rel (!%p149_p4) target bundleno = 132 (0x84), region = 36  ;;  %v157_v0 = vld [vmem:[%s403_s1] sm:$0xff] (%p149_p4)  ;;  %v325_v1 = vmov (%p149_p4), 0  }
   0xd   : > { %299 = vset.pattern.permute.xlu0 (%p149_p4), %v325_v1  ;;  %v155_v2 = vld [vmem:[%s404_s2] sm:$0xff] (%p149_p4) }
   0xe   : > { %160 = vperm.xlu0 (%p149_p4), %299, %v157_v0   ;;  %156 = vst [vmem:[%s405_s3] sm:$0xff] (%p149_p4), %v155_v2 }
  0x80   : > { %v161_v3 = vpop.permute.xlu0 %160 }
  0x81   : > { %v163_v4 = vmul.f32 %v161_v3, %v155_v2 }
  0x83   : > { %164 = vst [vmem:[#allocation2 + $0x8] sm:$0xff] %v163_v4 }
  0x84 PF: > { %s165_s22 = sadd.s32 1, %s315_s12  ;;  %v183_v5 = vld [vmem:[%s403_s1] sm:$0xff]  ;;  %v326_v6 = vmov 0   ;;  %vm186_vm0 = vcmask 64512   ;;  %s174_s6 = ssub.s32 0, %s315_s12 }
  0x85   : > { %p166_p5 = scmp.lt.s32.totalorder %s165_s22, 0  ;;  %s167_s25 = ssub.s32 0, %s165_s22  ;;  %300 = vset.pattern.permute.xlu0 %v326_v6  ;;  %v181_v7 = vld [vmem:[%s402_s0] sm:$0xff] }
  0x86   : > { %s265_s26 = smin.u32 %s167_s25, %s165_s22  ;;  %212 = vperm.xlu0 %300, %v183_v5   ;;  %s267_s7 = smin.u32 %s315_s12, %s174_s6 }
  0x87   : > { %s169_s27 = sand.u32 1, %s265_s26   ;;  %s176_s8 = sand.u32 1, %s267_s7  }
  0x88   : > { %s170_s28 = ssub.s32 0, %s169_s27  ;;  %p173_p6 = scmp.lt.s32.totalorder %s315_s12, 0  ;;  %v222_v12 = vld [vmem:[%s405_s3] sm:$0xff] }
  0x89   : > { %s411_s28 = smov (!%p166_p5, %s170_s28), %s169_s27  ;;  %s177_s9 = ssub.s32 0, %s176_s8 }
  0x8a   : > { %s266_s29 = sshll.u32 %s411_s28, 3  ;;  %s413_s9 = smov (!%p173_p6, %s177_s9), %s176_s8 }
  0x8b   : > { %s184_s5 = scalar_lea.vmem [#allocation2], %s266_s29  ;;  %s268_s10 = sshll.u32 %s413_s9, 3 }
  0x8c   : > { %v185_v8 = vld [vmem:[%s184_s5] sm:$0xff]  ;;  %s219_s17 = scalar_lea.vmem [#allocation2], %s268_s10 }
  0x8d   : > { %205 = vmatpush.msra.mxu0 %v185_v8 }
  0x8e   : > { %269 = vmatmul.msk.f32.vlgmr.msra.gmra.mxu0 %vm186_vm0, %v181_v7 }
  0xf8   : > { %v213_v9 = vpop.permute.xlu0 %212 }
 0x10b   : > { %v207_v10 = vpop.f32.mrf.mxu0 }
 0x10c   : > { %v215_v11 = vmul.f32 %v213_v9, %v207_v10 }
 0x10e   : > { %v216_v13 = vmax.f32 %v215_v11, 0.0 }
 0x110   : > { %v217_v14 = vmul.f32 %v216_v13, %v213_v9  ;;  %v223_v15 = vadd.f32 %v222_v12, %v216_v13 }
 0x112   : > { %220 = vst [vmem:[%s219_s17] sm:$0xff] %v217_v14 }
 0x113   : > { %224 = vst [vmem:[%s405_s3] sm:$0xff] %v223_v15 }
 0x114 PF: > { %s13_s14 = sadd.s32 1, %s323_s14   ;;  %s406_s12 = smov %s319_s13 }
 0x115   : > { %p10_p7 = scmp.ge.s32.totalorder %s13_s14, 4   ;;  %s407_s13 = smov %s409_s15 }
 0x117   :  { %12 = sbr.rel (!%p10_p7) target bundleno = 2 (0x2), region = 64 }

// kernel: agcn_forward.4
= control target key start
LH: loop header
LB: loop body
LE: loop exit
PB: predicated region body
PF: predicated region fallthrough
CT: control target
= control target key end

     0   :  { %vm37_vm0 = vcmask 64512   ;;  %vm53_vm4 = vcmask 7168   ;;  %s97_s1 = inlined_call_operand.vmem [shape: f32[8,128], index: 1, kind: input, shape index: {}, may-alias: {0,1}]   ;;  %s98_s0 = inlined_call_operand.vmem [shape: f32[8,128], index: 0, kind: input, shape index: {}, may-alias: {0,1}]   ;;  %s99_s2 = inlined_call_operand.vmem [shape: f32[8,8], index: 2, kind: output, shape index: {0}]   ;;  %s100_s3 = inlined_call_operand.vmem [shape: f32[8,1], index: 3, kind: output, shape index: {1}]  }
   0x1   :  { %v14_v0 = vld [vmem:[%s97_s1] sm:$0xff] }
   0x2   :  { %30 = vmatpush.xpose.msra.mxu0 %v14_v0  ;;  %v13_v1 = vld [vmem:[%s98_s0] sm:$0xff] }
   0x5   :  { %31 = vmatmul.f32.vlgmr.msra.gmra.mxu0 %v13_v1 }
  0x82   :  { %v32_v2 = vpop.f32.mrf.mxu0 }
  0x83   :  { %vm35_vm1 = vcmp.gt.f32.partialorder %v32_v2, 0.0 }
  0x84   :  { %v36_v3 = vsel %vm35_vm1, %v32_v2, 0.0 }
  0x85   :  { %38 = vst.msk [vmem:[%s99_s2] sm:$0xff] %vm37_vm0, %v36_v3  ;;  %v39_v4 = vsel %vm37_vm0, %v36_v3, 0.0 }
  0x86   :  { %40 = vadd.xlane.f32.xlu0 %v39_v4 }
  0xf9   :  { %v41_v5 = vpop.xlane.xlu0 %40 }
  0xfa   :  { %v42_v6 = vadd.f32 1e-08, %v41_v5 }
  0xfc   :  { %63 = vrsqrt.f32 %v42_v6  ;;  %vm49_vm3 = vweird.f32 %v42_v6 }
 0x102   :  { %v64_v7 = vpop.eup %63 }
 0x103   :  { %v44_v8 = vmul.f32 %v64_v7, %v42_v6  ;;  %vm50_vm2 = vweird.f32 %v64_v7 }
 0x104   :  { %vm51_vm5 = vmor %vm49_vm3, %vm50_vm2 }
 0x105   :  { %v45_v9 = vmul.f32 %v64_v7, %v44_v8 }
 0x107   :  { %v46_v10 = vmul.f32 0.5, %v45_v9 }
 0x109   :  { %v47_v11 = vsub.f32 1.5, %v46_v10 }
 0x10b   :  { %v48_v12 = vmul.f32 %v64_v7, %v47_v11 }
 0x10d   :  { %v52_v13 = vsel %vm51_vm5, %v64_v7, %v48_v12 }
 0x10e   :  { %54 = vst.msk [vmem:[%s100_s3] sm:$0xff] %vm53_vm4, %v52_v13 }

// kernel: agcn_forward.3
= control target key start
LH: loop header
LB: loop body
LE: loop exit
PB: predicated region body
PF: predicated region fallthrough
CT: control target
= control target key end

     0   :  { %7 = vsyncpa [#allocation3], 0  ;;  %s116_s12 = smov [#allocation2]   ;;  %s117_s14 = smov 128   ;;  %s143_s0 = inlined_call_operand.vmem [shape: f32[8,128], index: 0, kind: input, shape index: {}]   ;;  %s144_s1 = inlined_call_operand.hbm [shape: f32[128,128], index: 1, kind: input, shape index: {}]   ;;  %s145_s2 = inlined_call_operand.vmem [shape: f32[8,128], index: 2, kind: output, shape index: {}]  }
   0x1   :  { %s14_s11 = sshll.u32 %s144_s1, 4  ;;  %s16_s13 = sshll.u32 %s116_s12, 4  ;;  %s15_s11 = int_to_ptr.hbm [resolvable:$true] %s14_s11  ;;  %s17_s13 = int_to_ptr.vmem [resolvable:$true] %s16_s13 }
   0x2   :  { %s118_s15 = smov 8  }
   0x3   :  { %22 = dma.hbm_to_vmem [thread:$0]  %s15_s11, 2048, %s17_s13, [#allocation3], %s117_s14, %s117_s14, %s118_s15  }
   0x4   :  { %114 = dma.done.wait [#allocation3], 2048  }
   0x5   :  { %115 = vsyncadd [#allocation3], 4294965248  ;;  %v43_v0 = vld [vmem:[#allocation2 + $0x78] sm:$0xff]  ;;  %v42_v1 = vld [vmem:[#allocation2 + $0x70] sm:$0xff] }
   0x6   :  { %44 = vmatpush.msra.mxu0 %v43_v0  ;;  %v41_v2 = vld [vmem:[#allocation2 + $0x68] sm:$0xff]  ;;  %v40_v3 = vld [vmem:[#allocation2 + $0x60] sm:$0xff]  ;;  %v39_v4 = vld [vmem:[#allocation2 + $0x58] sm:$0xff] }
   0x7   :  { %v38_v5 = vld [vmem:[#allocation2 + $0x50] sm:$0xff]  ;;  %v37_v6 = vld [vmem:[#allocation2 + $0x48] sm:$0xff]  ;;  %v36_v7 = vld [vmem:[#allocation2 + $0x40] sm:$0xff] }
   0x8   :  { %45 = vmatpush.msra.mxu0 %v42_v1  ;;  %v35_v8 = vld [vmem:[#allocation2 + $0x38] sm:$0xff]  ;;  %v34_v9 = vld [vmem:[#allocation2 + $0x30] sm:$0xff]  ;;  %v33_v10 = vld [vmem:[#allocation2 + $0x28] sm:$0xff] }
   0x9   :  { %v32_v11 = vld [vmem:[#allocation2 + $0x20] sm:$0xff]  ;;  %v31_v12 = vld [vmem:[#allocation2 + $0x18] sm:$0xff]  ;;  %v30_v13 = vld [vmem:[#allocation2 + $0x10] sm:$0xff] }
   0xa   :  { %46 = vmatpush.msra.mxu0 %v41_v2  ;;  %v29_v14 = vld [vmem:[#allocation2 + $0x8] sm:$0xff]  ;;  %v28_v15 = vld [vmem:[#allocation2] sm:$0xff] }
   0xb   :  { %v27_v16 = vld [vmem:[%s143_s0] sm:$0xff] }
   0xc   :  { %47 = vmatpush.msra.mxu0 %v40_v3 }
   0xe   :  { %48 = vmatpush.msra.mxu0 %v39_v4 }
  0x10   :  { %49 = vmatpush.msra.mxu0 %v38_v5 }
  0x12   :  { %50 = vmatpush.msra.mxu0 %v37_v6 }
  0x14   :  { %51 = vmatpush.msra.mxu0 %v36_v7 }
  0x16   :  { %52 = vmatpush.msra.mxu0 %v35_v8 }
  0x18   :  { %53 = vmatpush.msra.mxu0 %v34_v9 }
  0x1a   :  { %54 = vmatpush.msra.mxu0 %v33_v10 }
  0x1c   :  { %55 = vmatpush.msra.mxu0 %v32_v11 }
  0x1e   :  { %56 = vmatpush.msra.mxu0 %v31_v12 }
  0x20   :  { %57 = vmatpush.msra.mxu0 %v30_v13 }
  0x22   :  { %58 = vmatpush.msra.mxu0 %v29_v14 }
  0x24   :  { %59 = vmatpush.msra.mxu0 %v28_v15 }
  0x25   :  { %60 = vmatmul.f32.vlgmr.msra.gmra.mxu0 %v27_v16 }
  0xa2   :  { %v61_v17 = vpop.f32.mrf.mxu0 }
  0xa3   :  { %v64_v18 = vmul.f32 %v61_v17, %v61_v17 }
  0xa5   :  { %65 = vadd.xlane.f32.xlu0 %v64_v18 }
 0x118   :  { %v66_v19 = vpop.xlane.xlu0 %65 }
 0x119   :  { %v67_v20 = vmax.f32 %v66_v19, 1e-24 }
 0x11b   :  { %88 = vrsqrt.f32 %v67_v20  ;;  %vm74_vm1 = vweird.f32 %v67_v20 }
 0x121   :  { %v89_v21 = vpop.eup %88 }
 0x122   :  { %v69_v22 = vmul.f32 %v89_v21, %v67_v20  ;;  %vm75_vm0 = vweird.f32 %v89_v21 }
 0x123   :  { %vm76_vm2 = vmor %vm74_vm1, %vm75_vm0 }
 0x124   :  { %v70_v23 = vmul.f32 %v89_v21, %v69_v22 }
 0x126   :  { %v71_v24 = vmul.f32 0.5, %v70_v23 }
 0x128   :  { %v72_v25 = vsub.f32 1.5, %v71_v24 }
 0x12a   :  { %v73_v26 = vmul.f32 %v89_v21, %v72_v25 }
 0x12c   :  { %v77_v27 = vsel %vm76_vm2, %v89_v21, %v73_v26 }
 0x12d   :  { %v78_v28 = vmul.f32 %v77_v27, %v61_v17 }
 0x12f   :  { %79 = vst [vmem:[%s145_s2] sm:$0xff] %v78_v28 }
 0x130   :  { %84 = vsyncpa [#allocation3], 1 }

</bundles_post_ra>
